<compile_context>
chip_gen: v6e
topology: v6e:2x2x1
jax: 0.10.0
libtpu: 0.0.40
codegen_flags: <defaults>
</compile_context>

<pallas_src>
import functools

import jax
import jax.numpy as jnp
from jax.experimental import pallas as pl
from jax.experimental.pallas import tpu as pltpu


def _round_up(x, m):
    return (x + m - 1) // m * m


def _vmem_budget_bytes():
    """Usable VMEM budget: physical capacity minus headroom, portable across v5e/v6e/v7x."""
    try:
        cap = int(pltpu.get_tpu_info().vmem_capacity_bytes)
    except Exception:
        cap = 64 << 20  # conservative fallback (v7x-sized)
    # ~56 MiB on v7x (64 MiB physical), ~100 MiB on v5e/v6e (128 MiB physical).
    return int(min(cap - cap // 8, 100 << 20))


# --------------------------------------------------------------------------------------
# Kernels
# --------------------------------------------------------------------------------------

def _proj_fast_kernel(x_ref, w_ref, b_ref, o_ref):
    # x_ref: (TM, D), w_ref: (V, D) resident, b_ref: (1, V), o_ref: (TM, V)
    logits = jax.lax.dot_general(
        x_ref[...], w_ref[...],
        dimension_numbers=(((1,), (1,)), ((), ())),
        preferred_element_type=jnp.float32)
    logits = logits + b_ref[...].astype(jnp.float32)
    m = jnp.max(logits, axis=-1, keepdims=True)
    lse = m + jnp.log(jnp.sum(jnp.exp(logits - m), axis=-1, keepdims=True))
    o_ref[...] = (logits - lse).astype(o_ref.dtype)


def _proj_stage_kernel(x_ref, w_ref, b_ref, logits_ref, lse_ref, m_ref, l_ref, *,
                       vocab_size, tile_vocab, mask_vocab):
    # x_ref: (TM, D)  w_ref: (TV, D)  b_ref: (1, TV)
    # logits_ref: (TM, TV) f32 staging  lse_ref: (TM, 1) f32
    # m_ref / l_ref: (TM, 1) f32 running max / running sum-exp (persist across vocab axis)
    k = pl.program_id(1)
    n_k = pl.num_programs(1)

    @pl.when(k == 0)
    def _init():
        m_ref[...] = jnp.full_like(m_ref, -jnp.inf)
        l_ref[...] = jnp.zeros_like(l_ref)

    # trans_b MXU matmul, f32 accumulation (weight kept in its (V, D) layout).
    logits = jax.lax.dot_general(
        x_ref[...], w_ref[...],
        dimension_numbers=(((1,), (1,)), ((), ())),
        preferred_element_type=jnp.float32)
    logits = logits + b_ref[...].astype(jnp.float32)

    def _update(lg):
        m_prev = m_ref[...]
        m_new = jnp.maximum(m_prev, jnp.max(lg, axis=-1, keepdims=True))
        l_ref[...] = (l_ref[...] * jnp.exp(m_prev - m_new)
                      + jnp.sum(jnp.exp(lg - m_new), axis=-1, keepdims=True))
        m_ref[...] = m_new

    if mask_vocab:
        # Only the last vocab tile has out-of-range columns; gate the iota/where so
        # the other tiles skip that VALU work at runtime.
        @pl.when(k != n_k - 1)
        def _full_tile():
            _update(logits)

        @pl.when(k == n_k - 1)
        def _tail_tile():
            col = jax.lax.broadcasted_iota(jnp.int32, logits.shape, 1) + k * tile_vocab
            _update(jnp.where(col < vocab_size, logits, -jnp.inf))
    else:
        _update(logits)

    # Stage raw logits; out-of-range columns are discarded on store.  The lse
    # subtraction happens in the cheap fix-up pass (no matmul recompute).
    logits_ref[...] = logits.astype(logits_ref.dtype)

    @pl.when(k == n_k - 1)
    def _emit_lse():
        lse_ref[...] = m_ref[...] + jnp.log(l_ref[...])


def _sub_lse_kernel(logits_ref, lse_ref, o_ref):
    o_ref[...] = (logits_ref[...] - lse_ref[...]).astype(o_ref.dtype)


# --------------------------------------------------------------------------------------
# Wrapper
# --------------------------------------------------------------------------------------

@functools.partial(
    jax.jit,
    static_argnames=("tile_rows", "tile_vocab", "compute_dtype", "force_tiled"))
def projection_layer(x, weight, bias, *, tile_rows=512, tile_vocab=None,
                     compute_dtype=jnp.bfloat16, force_tiled=False):
    """log_softmax(x @ weight.T + bias, axis=-1)  (PyTorch ProjectionLayer.forward).

    x: (..., D); weight: (V, D) (nn.Linear layout, NOT pre-transposed); bias: (V,).
    Returns x.shape[:-1] + (V,) in x.dtype.
    """
    *lead, D = x.shape
    V, D_w = weight.shape
    assert D == D_w, (D, D_w)
    n_rows = 1
    for s in lead:
        n_rows *= s
    out_dtype = x.dtype

    # Cheap casts only; the weight keeps its (V, D) layout (no HBM transpose copy).
    # TODO(synk): in a real model store the projection weight pre-cast to bf16 outside
    # the jitted step so this convert is not re-materialized every call.
    x2 = x.reshape(n_rows, D).astype(compute_dtype)
    w2 = weight.astype(compute_dtype)          # (V, D)
    b2 = bias.reshape(1, V).astype(jnp.float32)

    in_b = jnp.dtype(compute_dtype).itemsize
    out_b = jnp.dtype(out_dtype).itemsize
    usable = _vmem_budget_bytes()
    v_pad = _round_up(V, 128)
    headroom = 4 << 20

    # Row tile: MXU-friendly, multiple of 8, never larger than the (rounded) row count.
    tm = min(_round_up(tile_rows, 8), _round_up(n_rows, 8))

    # ---------------- small/medium-vocab fast path ----------------
    est_fast = (2 * tm * D * in_b           # x tiles (double buffered)
                + 2 * v_pad * D * in_b      # full weight (conservative x2)
                + 16 * v_pad                # bias
                + 2 * tm * v_pad * out_b    # output tiles
                + tm * v_pad * 4)           # in-kernel f32 logits
    if (not force_tiled) and est_fast <= int(usable * 0.9):
        out = pl.pallas_call(
            _proj_fast_kernel,
            out_shape=jax.ShapeDtypeStruct((n_rows, V), out_dtype),
            grid_spec=pltpu.PrefetchScalarGridSpec(
                num_scalar_prefetch=0,
                grid=(pl.cdiv(n_rows, tm),),
                in_specs=[
                    pl.BlockSpec((tm, D), lambda i: (i, 0)),
                    pl.BlockSpec((V, D), lambda i: (0, 0)),   # fetched once, stays resident
                    pl.BlockSpec((1, V), lambda i: (0, 0)),
                ],
                out_specs=pl.BlockSpec((tm, V), lambda i: (i, 0)),
            ),
            compiler_params=pltpu.CompilerParams(
                dimension_semantics=("parallel",),
                vmem_limit_bytes=usable,
            ),
        )(x2, w2, b2)
        return out.reshape(*lead, V)

    # ---------------- large-vocab path: single sweep + lse fix-up ----------------
    # Adaptive vocab tile: biggest lane-dense multiple of 128 whose working set
    # (weight + staged-logit + bias double buffers, resident x tile, lse, m/l scratch)
    # fits the per-generation VMEM budget.
    while True:
        fixed = 2 * tm * D * in_b + 4 * tm * 512 + headroom
        per_tv = 2 * D * in_b + 2 * tm * 4 + 64
        tv = (usable - fixed) // per_tv if usable > fixed else 0
        tv = min(tv, v_pad, 4096)
        tv = (tv // 128) * 128
        if tv >= 128 or tm <= 8:
            break
        tm = max(8, tm // 2)
    if V >= 128:
        tv = int(max(tv, 128))
        if tile_vocab is not None:
            tv = min(tv, max(_round_up(tile_vocab, 128), 128))
    else:
        tv = V

    n_row_tiles = pl.cdiv(n_rows, tm)
    n_voc_tiles = pl.cdiv(V, tv)
    mask_vocab = (V % tv) != 0

    kernel = functools.partial(
        _proj_stage_kernel, vocab_size=V, tile_vocab=tv, mask_vocab=mask_vocab)

    logits_f32, lse = pl.pallas_call(
        kernel,
        out_shape=(jax.ShapeDtypeStruct((n_rows, V), jnp.float32),
                   jax.ShapeDtypeStruct((n_rows, 1), jnp.float32)),
        grid_spec=pltpu.PrefetchScalarGridSpec(
            num_scalar_prefetch=0,
            grid=(n_row_tiles, n_voc_tiles),
            in_specs=[
                pl.BlockSpec((tm, D), lambda i, k: (i, 0)),   # x resident over the vocab sweep
                pl.BlockSpec((tv, D), lambda i, k: (k, 0)),   # (V, D) weight streamed, no transpose
                pl.BlockSpec((1, tv), lambda i, k: (0, k)),
            ],
            out_specs=[
                pl.BlockSpec((tm, tv), lambda i, k: (i, k)),  # raw logits, written every step
                pl.BlockSpec((tm, 1), lambda i, k: (i, 0)),   # lse, written on the last vocab tile
            ],
            scratch_shapes=[
                pltpu.VMEM((tm, 1), jnp.float32),   # running max m
                pltpu.VMEM((tm, 1), jnp.float32),   # running sum-exp l
            ],
        ),
        compiler_params=pltpu.CompilerParams(
            dimension_semantics=("parallel", "arbitrary"),
            vmem_limit_bytes=usable,
        ),
    )(x2, w2, b2)

    # Fix-up: out = logits - lse.  Memory-bound elementwise pass; re-reads only the staged
    # logits (~16x cheaper than a weight re-stream at large D).  Aliases the staging buffer
    # as the output when dtypes match.
    tm2 = min(_round_up(512, 8), _round_up(n_rows, 8))
    per = tm2 * 2 * (4 + out_b) + 64
    tv2 = (usable - 2 * tm2 * 512 - headroom) // per
    tv2 = min((tv2 // 128) * 128, v_pad)
    tv2 = int(max(tv2, 128)) if V >= 128 else V

    alias = {0: 0} if out_dtype == jnp.float32 else {}
    out = pl.pallas_call(
        _sub_lse_kernel,
        out_shape=jax.ShapeDtypeStruct((n_rows, V), out_dtype),
        grid_spec=pltpu.PrefetchScalarGridSpec(
            num_scalar_prefetch=0,
            grid=(pl.cdiv(n_rows, tm2), pl.cdiv(V, tv2)),
            in_specs=[
                pl.BlockSpec((tm2, tv2), lambda i, k: (i, k)),
                pl.BlockSpec((tm2, 1), lambda i, k: (i, 0)),
            ],
            out_specs=pl.BlockSpec((tm2, tv2), lambda i, k: (i, k)),
        ),
        compiler_params=pltpu.CompilerParams(
            dimension_semantics=("parallel", "parallel"),
            vmem_limit_bytes=usable,
        ),
        input_output_aliases=alias,
    )(logits_f32, lse)

    return out.reshape(*lead, V)


# --------------------------------------------------------------------------------------
# Demo / self-test
# --------------------------------------------------------------------------------------

if __name__ == "__main__":
    def ref_bf16(x, w, b):
        lg = jnp.dot(x.reshape(-1, x.shape[-1]).astype(jnp.bfloat16),
                     w.T.astype(jnp.bfloat16),
                     preferred_element_type=jnp.float32) + b
        return jax.nn.log_softmax(lg, axis=-1).reshape(x.shape[:-1] + (w.shape[0],))

    # Small shapes consistent with the module: (batch, seq, d_model) -> (batch, seq, vocab).
    batch, seq, d_model, vocab_size = 2, 8, 32, 128
    key = jax.random.PRNGKey(0)
    kx, kw, kb = jax.random.split(key, 3)
    bound = 1.0 / (d_model ** 0.5)     # nn.Linear default init range
    weight = jax.random.uniform(kw, (vocab_size, d_model), jnp.float32, -bound, bound)
    bias = jax.random.uniform(kb, (vocab_size,), jnp.float32, -bound, bound)
    x = jax.random.normal(kx, (batch, seq, d_model), jnp.float32)

    out = jax.block_until_ready(projection_layer(x, weight, bias))
    assert out.shape == (batch, seq, vocab_size)

    # Reference 1: identical bf16-input / f32-accumulation math (tight tolerance).
    ref1 = ref_bf16(x, weight, bias)
    assert jnp.allclose(out, ref1, atol=2e-3, rtol=2e-3), float(jnp.max(jnp.abs(out - ref1)))
    # Reference 2: full-f32 semantics of the PyTorch module (loose, bf16 cast error).
    ref2 = jax.nn.log_softmax(x @ weight.T + bias, axis=-1)
    assert jnp.allclose(out, ref2, atol=1e-1, rtol=1e-1)

    # Exercise the tiled (streamed-vocab + lse fix-up) path with row and vocab tails.
    b2_, s2_, d2_, v2_ = 2, 80, 64, 320
    k2x, k2w, k2b = jax.random.split(jax.random.PRNGKey(0), 3)
    w_t = jax.random.uniform(k2w, (v2_, d2_), jnp.float32, -0.1, 0.1)
    b_t = jax.random.uniform(k2b, (v2_,), jnp.float32, -0.1, 0.1)
    x_t = jax.random.normal(k2x, (b2_, s2_, d2_), jnp.float32)
    out_t = jax.block_until_ready(
        projection_layer(x_t, w_t, b_t, tile_rows=64, tile_vocab=128, force_tiled=True))
    assert out_t.shape == (b2_, s2_, v2_)
    ref_t = ref_bf16(x_t, w_t, b_t)
    assert jnp.allclose(out_t, ref_t, atol=2e-3, rtol=2e-3), float(jnp.max(jnp.abs(out_t - ref_t)))

    print("KERNEL_OK")
</pallas_src>

<mosaic_0001>
module attributes {stable_mosaic.version = 11 : i64} {
  func.func @_proj_fast_kernel(%arg0: i32, %arg1: memref<16x32xbf16, #tpu.memory_space<vmem>>, %arg2: memref<128x32xbf16, #tpu.memory_space<vmem>>, %arg3: memref<1x128xf32, #tpu.memory_space<vmem>>, %arg4: memref<16x128xf32, #tpu.memory_space<vmem>>) attributes {dimension_semantics = [#tpu.dimension_semantics<parallel>], iteration_bounds = array<i64: 1>, scalar_prefetch = 0 : i64, scratch_operands = 0 : i64, tpu.core_type = #tpu.core_type<tc>, window_params = [{transform_indices = @transform_0, window_bounds = array<i64: 16, 32>}, {pipeline_mode = #tpu.pipeline_mode<synchronous>, transform_indices = @transform_1, window_bounds = array<i64: 128, 32>}, {pipeline_mode = #tpu.pipeline_mode<synchronous>, transform_indices = @transform_2, window_bounds = array<i64: 1, 128>}, {transform_indices = @transform_3, window_bounds = array<i64: 16, 128>}]} {
    %c0 = arith.constant 0 : index
    %c0_0 = arith.constant 0 : index
    %0 = vector.load %arg1[%c0, %c0_0] : memref<16x32xbf16, #tpu.memory_space<vmem>>, vector<16x32xbf16>
    %c0_1 = arith.constant 0 : index
    %c0_2 = arith.constant 0 : index
    %1 = vector.load %arg2[%c0_1, %c0_2] : memref<128x32xbf16, #tpu.memory_space<vmem>>, vector<128x32xbf16>
    %cst = arith.constant dense<0.000000e+00> : vector<16x128xf32>
    %2 = tpu.matmul %0, %1, %cst {dimension_numbers = #tpu.dot_dimension_numbers<[1], [1], [0], [0], [0, 0, 1, 0], [], []>} : vector<16x32xbf16>, vector<128x32xbf16>, vector<16x128xf32> -> vector<16x128xf32>
    %c0_3 = arith.constant 0 : index
    %c0_4 = arith.constant 0 : index
    %3 = vector.load %arg3[%c0_3, %c0_4] : memref<1x128xf32, #tpu.memory_space<vmem>>, vector<1x128xf32>
    %4 = vector.broadcast %3 : vector<1x128xf32> to vector<16x128xf32>
    %5 = arith.addf %2, %4 : vector<16x128xf32>
    %cst_5 = arith.constant dense<0xFF800000> : vector<16xf32>
    %6 = vector.multi_reduction <maximumf>, %5, %cst_5 [1] : vector<16x128xf32> to vector<16xf32>
    %7 = vector.shape_cast %6 : vector<16xf32> to vector<16x1xf32>
    %8 = vector.broadcast %7 : vector<16x1xf32> to vector<16x128xf32>
    %9 = arith.subf %5, %8 : vector<16x128xf32>
    %10 = math.exp %9 : vector<16x128xf32>
    %cst_6 = arith.constant dense<0.000000e+00> : vector<16xf32>
    %11 = vector.multi_reduction <add>, %10, %cst_6 [1] : vector<16x128xf32> to vector<16xf32>
    %12 = vector.shape_cast %11 : vector<16xf32> to vector<16x1xf32>
    %13 = math.log %12 : vector<16x1xf32>
    %14 = arith.addf %7, %13 : vector<16x1xf32>
    %15 = vector.broadcast %14 : vector<16x1xf32> to vector<16x128xf32>
    %16 = arith.subf %5, %15 : vector<16x128xf32>
    %c0_7 = arith.constant 0 : index
    %c0_8 = arith.constant 0 : index
    %17 = vector.load %arg4[%c0_7, %c0_8] : memref<16x128xf32, #tpu.memory_space<vmem>>, vector<16x128xf32>
    tpu.vector_store %arg4[%c0_7, %c0_8], %16 {strides = array<i32>} : memref<16x128xf32, #tpu.memory_space<vmem>>, vector<16x128xf32>,
    return
  }
  func.func @transform_0(%arg0: i32) -> (i32, i32) {
    %c0_i32 = arith.constant 0 : i32
    %c0_i32_0 = arith.constant 0 : i32
    return %arg0, %c0_i32 : i32, i32
  }
  func.func @transform_1(%arg0: i32) -> (i32, i32) {
    %c0_i32 = arith.constant 0 : i32
    %c0_i32_0 = arith.constant 0 : i32
    %c0_i32_1 = arith.constant 0 : i32
    return %c0_i32, %c0_i32_0 : i32, i32
  }
  func.func @transform_2(%arg0: i32) -> (i32, i32) {
    %c0_i32 = arith.constant 0 : i32
    %c0_i32_0 = arith.constant 0 : i32
    %c0_i32_1 = arith.constant 0 : i32
    return %c0_i32, %c0_i32_0 : i32, i32
  }
  func.func @transform_3(%arg0: i32) -> (i32, i32) {
    %c0_i32 = arith.constant 0 : i32
    %c0_i32_0 = arith.constant 0 : i32
    return %arg0, %c0_i32 : i32, i32
  }
}

</mosaic_0001>

<bundles_post_ra>
// kernel: projection_layer.1
= control target key start
LH: loop header
LB: loop body
LE: loop exit
PB: predicated region body
PF: predicated region fallthrough
CT: control target
= control target key end

     0   :  { %v279_v1 = vmov 0.0   ;;  %vm86_vm0 = vcmask 261120   ;;  %vm280_vm1 = vmmov 0   ;;  %s346_s0 = inlined_call_operand.vmem [shape: bf16[16,32], index: 0, kind: input, shape index: {}]   ;;  %s347_s1 = inlined_call_operand.vmem [shape: bf16[128,32], index: 1, kind: input, shape index: {}]   ;;  %s348_s2 = inlined_call_operand.vmem [shape: f32[1,128], index: 2, kind: input, shape index: {}]   ;;  %s349_s3 = inlined_call_operand.hbm [shape: f32[16,128], index: 3, kind: output, shape index: {}]  }
   0x1   :  { %v240_v0 = vld [vmem:[%s347_s1 + $0x38] sm:$0xff]   ;;  %215 = vmatprep.subr.bf16.mxu0 %v279_v1  ;;  %v241_v3 = vld [vmem:[%s347_s1 + $0x30] sm:$0xff]   ;;  %231 = vmatprep.mubr.msk.bf16.mxu0 %vm280_vm1, %v279_v1 }
   0x2   :  { %v112_v2 = vsel %vm86_vm0, %v240_v0, 0  ;;  %v109_v4 = vsel %vm86_vm0, %v241_v3, 0 }
   0x3   :  { %216 = vmatpush3.bf16.xpose.msra.mxu0 %v112_v2 }
   0x4   :  { %217 = vmatprep.subr.bf16.mxu0 %v279_v1 }
   0x5   :  { %8 = vsyncpa [#allocation3], 0  ;;  %v242_v5 = vld [vmem:[%s347_s1 + $0x28] sm:$0xff]   ;;  %v243_v7 = vld [vmem:[%s347_s1 + $0x20] sm:$0xff]  }
   0x6   :  { %v106_v6 = vsel %vm86_vm0, %v242_v5, 0  ;;  %v103_v8 = vsel %vm86_vm0, %v243_v7, 0  ;;  %v244_v9 = vld [vmem:[%s347_s1 + $0x18] sm:$0xff]   ;;  %v245_v11 = vld [vmem:[%s347_s1 + $0x10] sm:$0xff]   ;;  %v246_v13 = vld [vmem:[%s347_s1 + $0x8] sm:$0xff]  }
   0x7   :  { %v100_v10 = vsel %vm86_vm0, %v244_v9, 0  ;;  %v97_v12 = vsel %vm86_vm0, %v245_v11, 0  ;;  %v94_v14 = vsel %vm86_vm0, %v246_v13, 0  ;;  %v247_v15 = vld [vmem:[%s347_s1] sm:$0xff]  }
   0x8   :  { %v91_v16 = vsel %vm86_vm0, %v247_v15, 0  ;;  %v248_v17 = vld [vmem:[%s346_s0] sm:$0xff]   ;;  %s281_s0 = smov [#allocation2]  }
   0x9   :  { %v195_v18 = vld [vmem:[%s348_s2] ss:$0 sm:$0xff]  ;;  %s184_s1 = sshll.u32 %s281_s0, 4  ;;  %s185_s1 = int_to_ptr.vmem [resolvable:$true] %s184_s1 }
   0xa   :  { %s257_s2 = scalar_lea.vmem %s185_s1, 256  ;;  %p262_p1 = scmp.lt.s32.totalorder %s185_s1, %s185_s1 }
   0xb   :  { %218 = vmatpush3.bf16.xpose.msra.mxu0 %v109_v4  ;;  %p258_p0 = scmp.ne.s32.totalorder %s185_s1, %s257_s2  ;;  %p263_p2 = scmp.lt.s32.totalorder %s257_s2, %s257_s2 }
   0xc   :  { %219 = vmatprep.subr.bf16.mxu0 %v279_v1 }
   0xd   :  { %p264_p3 = por %p263_p2, %p262_p1 }
   0xf   :  { %p265_p4 = pnand %p264_p3, %p258_p0 }
  0x13   :  { %220 = vmatpush3.bf16.xpose.msra.mxu0 %v106_v6 }
  0x14   :  { %221 = vmatprep.subr.bf16.mxu0 %v279_v1 }
  0x1b   :  { %222 = vmatpush3.bf16.xpose.msra.mxu0 %v103_v8 }
  0x1c   :  { %223 = vmatprep.subr.bf16.mxu0 %v279_v1 }
  0x23   :  { %224 = vmatpush3.bf16.xpose.msra.mxu0 %v100_v10 }
  0x24   :  { %225 = vmatprep.subr.bf16.mxu0 %v279_v1 }
  0x2b   :  { %226 = vmatpush3.bf16.xpose.msra.mxu0 %v97_v12 }
  0x2c   :  { %227 = vmatprep.subr.bf16.mxu0 %v279_v1 }
  0x33   :  { %228 = vmatpush3.bf16.xpose.msra.mxu0 %v94_v14 }
  0x34   :  { %229 = vmatprep.subr.bf16.mxu0 %v279_v1 }
  0x3b   :  { %230 = vmatpush3.bf16.xpose.msra.mxu0 %v91_v16 }
  0x42   :  { %232 = vmatmul.mubr.msk.bf16.vlgmr.msra.gmra.mxu0 %vm86_vm0, %v248_v17 }
 0x102   :  { %v148_v19 = vpop.f32.mrf.mxu0 }
 0x103   :  { %v149_v20 = vadd.f32 %v195_v18, %v148_v19 }
 0x104   :  { %v233_v21 = vpop.f32.mrf.mxu0 }
 0x105   :  { %155 = vmax.xlane.f32.xlu0 %v149_v20 }
 0x106   :  { %v151_v22 = vpop.f32.mrf.mxu0 }
 0x107   :  { %v152_v23 = vadd.f32 %v195_v18, %v151_v22 }
 0x108   :  { %v234_v24 = vpop.f32.mrf.mxu0 }
 0x109   :  { %157 = vmax.xlane.f32.xlu0 %v152_v23 }
 0x18e   :  { %v156_v25 = vpop.xlane.xlu0 %155 }
 0x18f   :  { %v159_v26 = vsub.f32 %v149_v20, %v156_v25 }
 0x191   :  { %v161_v27 = vmul.f32 1.442695, %v159_v26 }
 0x192   :  { %v158_v28 = vpop.xlane.xlu0 %157 }
 0x193   :  { %249 = vpow2.f32 %v161_v27  ;;  %v160_v29 = vsub.f32 %v152_v23, %v158_v28 }
 0x195   :  { %v163_v30 = vmul.f32 1.442695, %v160_v29 }
 0x197   :  { %251 = vpow2.f32 %v163_v30 }
 0x1a0   :  { %v250_v31 = vpop.eup %249 }
 0x1a1   :  { %165 = vadd.xlane.f32.xlu1 %v250_v31 }
 0x1a4   :  { %v252_v32 = vpop.eup %251 }
 0x1a5   :  { %167 = vadd.xlane.f32.xlu1 %v252_v32 }
 0x22a   :  { %v166_v33 = vpop.xlane.xlu1 %165 }
 0x22b   :  { %253 = vlog2.f32 %v166_v33 }
 0x22e   :  { %v168_v34 = vpop.xlane.xlu1 %167 }
 0x22f   :  { %255 = vlog2.f32 %v168_v34 }
 0x238   :  { %v254_v35 = vpop.eup %253 }
 0x239   :  { %v170_v36 = vmul.f32 0.6931472, %v254_v35 }
 0x23b   :  { %v173_v37 = vadd.f32 %v170_v36, %v156_v25 }
 0x23c   :  { %v256_v38 = vpop.eup %255 }
 0x23d   :  { %v175_v39 = vsub.f32 %v149_v20, %v173_v37  ;;  %v172_v40 = vmul.f32 0.6931472, %v256_v38 }
 0x23f   :  { %177 = vst [vmem:[#allocation2] sm:$0xff] %v175_v39  ;;  %v174_v41 = vadd.f32 %v172_v40, %v158_v28 }
 0x241   :  { %v176_v42 = vsub.f32 %v152_v23, %v174_v41 }
 0x243   :  { %178 = vst [vmem:[#allocation2 + $0x8] sm:$0xff] %v176_v42 }
 0x244   :  { %268 = shalt.err (!%p265_p4)
}
 0x245   :  { %s282_s5 = smov 128   ;;  %s283_s6 = smov 8  }
 0x246   :  { %190 = dma.vmem_to_hbm [thread:$0]  %s185_s1, 256, %s349_s3, [#allocation3], %s282_s5, %s282_s5, %s283_s6  }
 0x247   :  { %277 = dma.done.wait [#allocation3], 256  }
 0x248   :  { %278 = vsyncadd [#allocation3], 4294967040 }
 0x249   :  { %194 = vsyncpa [#allocation3], 1 }

</bundles_post_ra>
